<compile_context>
chip_gen: v7x
topology: tpu7x:2x2x1
jax: 0.10.0
libtpu: 0.0.40
codegen_flags: <defaults>
</compile_context>

<pallas_src>
import functools

import jax
import jax.numpy as jnp
from jax.experimental import pallas as pl
from jax.experimental.pallas import tpu as pltpu

EPS = 1e-5
LANE = 128
SUBLANE = 8


def _round_up(x, m):
    return (x + m - 1) // m * m


# ---------------- Pass 1: conv matmul + per-channel sum / sum-of-squares ----

def _conv_stats_kernel(p_ref, w_ref, y_ref, sum_ref, sumsq_ref):
    """One row tile of the im2col matmul plus running BN statistics.

    p_ref     : (TM, P_pad)     im2col patch rows for this tile
    w_ref     : (P_pad, C_pad)  flattened conv weight (same block every step)
    y_ref     : (TM, C_pad)     conv output tile (pre-BN)
    sum_ref   : (1, C_pad)      running per-channel sum      (resident accumulator)
    sumsq_ref : (1, C_pad)      running per-channel sum(y^2) (resident accumulator)
    """
    i = pl.program_id(0)

    @pl.when(i == 0)
    def _():
        sum_ref[...] = jnp.zeros_like(sum_ref)
        sumsq_ref[...] = jnp.zeros_like(sumsq_ref)

    y = jnp.dot(p_ref[...], w_ref[...], preferred_element_type=jnp.float32)
    y_ref[...] = y.astype(y_ref.dtype)

    # Training-mode BN stats accumulated across row tiles.  Padded rows are
    # exactly zero (zero patches x weight, no bias) so they contribute nothing;
    # the finalize pass divides by the true row count R.
    sum_ref[...] += jnp.sum(y, axis=0, keepdims=True)
    sumsq_ref[...] += jnp.sum(y * y, axis=0, keepdims=True)


# ---------------- Pass 2: normalize + affine + ReLU --------------------------

def _bn_relu_kernel(inv_count, y_ref, sum_ref, sumsq_ref, g_ref, b_ref, o_ref):
    """o = relu((y - mean) * rsqrt(var + eps) * gamma + beta)."""
    mean = sum_ref[...] * inv_count                              # (1, C_pad)
    var = jnp.maximum(sumsq_ref[...] * inv_count - mean * mean, 0.0)
    scale = g_ref[...] * jax.lax.rsqrt(var + EPS)                # (1, C_pad)
    shift = b_ref[...] - mean * scale                            # (1, C_pad)
    o_ref[...] = jnp.maximum(y_ref[...] * scale + shift, 0.0).astype(o_ref.dtype)


# ---------------- Wrapper -----------------------------------------------------

def _im2col(x, k, stride, padding):
    # x: (N, C, H, W) -> patches (N*Ho*Wo, C*k*k), plus Ho, Wo
    n, c, h, w = x.shape
    xp = jnp.pad(x, ((0, 0), (0, 0), (padding, padding), (padding, padding)))
    ho = (h + 2 * padding - k) // stride + 1
    wo = (w + 2 * padding - k) // stride + 1
    cols = []
    for i in range(k):
        for j in range(k):
            cols.append(xp[:, :, i:i + ho * stride:stride, j:j + wo * stride:stride])
    # flattened patch index = c*k*k + i*k + j (matches weight.reshape(C_out, -1))
    p = jnp.stack(cols, axis=2)
    p = p.transpose(0, 3, 4, 1, 2).reshape(n * ho * wo, c * k * k)
    return p, ho, wo


def conv2d_bn_relu(x, weight, bias, gamma, beta, *, stride=1, padding=0,
                   block_rows=512):
    """Conv2d -> BatchNorm2d (training batch stats) -> ReLU.  NCHW in/out."""
    n, c_in, h, w = x.shape
    c_out, _, k, _ = weight.shape

    patches, ho, wo = _im2col(x, k, stride, padding)              # (R, P)
    r, p = patches.shape

    # Lane-dense / MXU-friendly padding.
    c_pad = _round_up(c_out, LANE)
    p_pad = _round_up(p, LANE)
    tm = _round_up(min(block_rows, r), SUBLANE)
    r_pad = _round_up(r, tm)
    n_tiles = r_pad // tm

    patches_p = jnp.pad(patches, ((0, r_pad - r), (0, p_pad - p)))
    w_mat = jnp.pad(weight.reshape(c_out, c_in * k * k).T,
                    ((0, p_pad - p), (0, c_pad - c_out)))          # (P_pad, C_pad)
    g_row = jnp.pad(gamma.reshape(1, c_out), ((0, 0), (0, c_pad - c_out)))
    b_row = jnp.pad(beta.reshape(1, c_out), ((0, 0), (0, c_pad - c_out)))
    # Conv bias is a per-channel constant added before training-mode BN: it is
    # cancelled exactly by the mean subtraction, so it is dropped (free win).
    del bias

    # ---- Pass 1: tiled matmul + accumulated per-channel stats ---------------
    y, ch_sum, ch_sumsq = pl.pallas_call(
        _conv_stats_kernel,
        out_shape=(
            jax.ShapeDtypeStruct((r_pad, c_pad), jnp.float32),
            jax.ShapeDtypeStruct((1, c_pad), jnp.float32),
            jax.ShapeDtypeStruct((1, c_pad), jnp.float32),
        ),
        grid=(n_tiles,),
        in_specs=[
            pl.BlockSpec((tm, p_pad), lambda i: (i, 0)),
            pl.BlockSpec((p_pad, c_pad), lambda i: (0, 0)),
        ],
        out_specs=(
            pl.BlockSpec((tm, c_pad), lambda i: (i, 0)),
            pl.BlockSpec((1, c_pad), lambda i: (0, 0)),
            pl.BlockSpec((1, c_pad), lambda i: (0, 0)),
        ),
        compiler_params=pltpu.CompilerParams(
            dimension_semantics=("arbitrary",),   # stats accumulate across tiles
            vmem_limit_bytes=32 * 1024 * 1024,
        ),
        cost_estimate=pl.CostEstimate(
            flops=2 * r_pad * p_pad * c_pad,
            transcendentals=0,
            bytes_accessed=4 * (r_pad * p_pad + p_pad * c_pad + r_pad * c_pad),
        ),
    )(patches_p, w_mat)

    # ---- Pass 2: normalize + affine + ReLU (independent row tiles) ----------
    out = pl.pallas_call(
        functools.partial(_bn_relu_kernel, 1.0 / r),
        out_shape=jax.ShapeDtypeStruct((r_pad, c_pad), jnp.float32),
        grid=(n_tiles,),
        in_specs=[
            pl.BlockSpec((tm, c_pad), lambda i: (i, 0)),
            pl.BlockSpec((1, c_pad), lambda i: (0, 0)),
            pl.BlockSpec((1, c_pad), lambda i: (0, 0)),
            pl.BlockSpec((1, c_pad), lambda i: (0, 0)),
            pl.BlockSpec((1, c_pad), lambda i: (0, 0)),
        ],
        out_specs=pl.BlockSpec((tm, c_pad), lambda i: (i, 0)),
        compiler_params=pltpu.CompilerParams(
            dimension_semantics=("parallel",),
            vmem_limit_bytes=32 * 1024 * 1024,
        ),
        cost_estimate=pl.CostEstimate(
            flops=4 * r_pad * c_pad,
            transcendentals=c_pad,
            bytes_accessed=4 * 2 * r_pad * c_pad,
        ),
    )(y, ch_sum, ch_sumsq, g_row, b_row)

    # Back to NCHW to match the PyTorch module's output contract.
    # TODO(synk): a fully fused network could consume the lane-dense (R, C_pad)
    # layout directly and skip this transpose round-trip.
    out = out[:r, :c_out]
    return out.reshape(n, ho, wo, c_out).transpose(0, 3, 1, 2)


# ---------------- Reference & test -------------------------------------------

def _reference(x, weight, bias, gamma, beta, *, stride=1, padding=0):
    y = jax.lax.conv_general_dilated(
        x, weight, window_strides=(stride, stride),
        padding=[(padding, padding), (padding, padding)],
        dimension_numbers=("NCHW", "OIHW", "NCHW"),
    ) + bias[None, :, None, None]
    mean = jnp.mean(y, axis=(0, 2, 3), keepdims=True)
    var = jnp.mean((y - mean) ** 2, axis=(0, 2, 3), keepdims=True)
    y = (y - mean) * jax.lax.rsqrt(var + EPS)
    y = y * gamma[None, :, None, None] + beta[None, :, None, None]
    return jnp.maximum(y, 0.0)


if __name__ == "__main__":
    key = jax.random.PRNGKey(0)
    k_x, k_w, k_b, k_g, k_beta = jax.random.split(key, 5)

    N, C_IN, H, W = 2, 4, 16, 16
    C_OUT, K, STRIDE, PAD = 8, 3, 1, 1

    x = jax.random.normal(k_x, (N, C_IN, H, W), dtype=jnp.float32)
    weight = jax.random.normal(k_w, (C_OUT, C_IN, K, K), dtype=jnp.float32) * 0.1
    bias = jax.random.normal(k_b, (C_OUT,), dtype=jnp.float32) * 0.1
    gamma = 1.0 + 0.1 * jax.random.normal(k_g, (C_OUT,), dtype=jnp.float32)
    beta = 0.1 * jax.random.normal(k_beta, (C_OUT,), dtype=jnp.float32)

    # block_rows=128 -> 4 row tiles (R = 512): exercises the accumulated-stats
    # grid path and the parallel apply pass.
    out = conv2d_bn_relu(x, weight, bias, gamma, beta,
                         stride=STRIDE, padding=PAD, block_rows=128)
    out = jax.block_until_ready(out)

    ref = _reference(x, weight, bias, gamma, beta, stride=STRIDE, padding=PAD)
    assert out.shape == (N, C_OUT, H, W), out.shape
    max_err = float(jnp.max(jnp.abs(out - ref)))
    assert jnp.allclose(out, ref, rtol=1e-4, atol=1e-4), max_err

    print("KERNEL_OK")
</pallas_src>

<mosaic_0001>
module attributes {stable_mosaic.version = 11 : i64} {
  func.func @_conv_stats_kernel(%arg0: i32, %arg1: memref<128x128xf32, #tpu.memory_space<vmem>>, %arg2: memref<128x128xf32, #tpu.memory_space<vmem>>, %arg3: memref<128x128xf32, #tpu.memory_space<vmem>>, %arg4: memref<1x128xf32, #tpu.memory_space<vmem>>, %arg5: memref<1x128xf32, #tpu.memory_space<vmem>>) attributes {dimension_semantics = [#tpu.dimension_semantics<arbitrary>], iteration_bounds = array<i64: 4>, scalar_prefetch = 0 : i64, scratch_operands = 0 : i64, tpu.core_type = #tpu.core_type<tc>, window_params = [{transform_indices = @transform_0, window_bounds = array<i64: 128, 128>}, {pipeline_mode = #tpu.pipeline_mode<synchronous>, transform_indices = @transform_1, window_bounds = array<i64: 128, 128>}, {transform_indices = @transform_2, window_bounds = array<i64: 128, 128>}, {pipeline_mode = #tpu.pipeline_mode<synchronous>, transform_indices = @transform_3, window_bounds = array<i64: 1, 128>}, {pipeline_mode = #tpu.pipeline_mode<synchronous>, transform_indices = @transform_4, window_bounds = array<i64: 1, 128>}]} {
    %c0_i32 = arith.constant 0 : i32
    %0 = arith.cmpi eq, %arg0, %c0_i32 : i32
    %1 = arith.extui %0 : i1 to i32
    %c0_i32_0 = arith.constant 0 : i32
    %2 = arith.cmpi ne, %1, %c0_i32_0 : i32
    scf.if %2 {
      %cst_16 = arith.constant 0.000000e+00 : f32
      %18 = vector.broadcast %cst_16 : f32 to vector<1x128xf32>
      %c0_17 = arith.constant 0 : index
      %c0_18 = arith.constant 0 : index
      %19 = vector.load %arg4[%c0_17, %c0_18] : memref<1x128xf32, #tpu.memory_space<vmem>>, vector<1x128xf32>
      tpu.vector_store %arg4[%c0_17, %c0_18], %18 {strides = array<i32>} : memref<1x128xf32, #tpu.memory_space<vmem>>, vector<1x128xf32>,
      %cst_19 = arith.constant 0.000000e+00 : f32
      %20 = vector.broadcast %cst_19 : f32 to vector<1x128xf32>
      %c0_20 = arith.constant 0 : index
      %c0_21 = arith.constant 0 : index
      %21 = vector.load %arg5[%c0_20, %c0_21] : memref<1x128xf32, #tpu.memory_space<vmem>>, vector<1x128xf32>
      tpu.vector_store %arg5[%c0_20, %c0_21], %20 {strides = array<i32>} : memref<1x128xf32, #tpu.memory_space<vmem>>, vector<1x128xf32>,
    } else {
    }
    %c0 = arith.constant 0 : index
    %c0_1 = arith.constant 0 : index
    %3 = vector.load %arg1[%c0, %c0_1] : memref<128x128xf32, #tpu.memory_space<vmem>>, vector<128x128xf32>
    %c0_2 = arith.constant 0 : index
    %c0_3 = arith.constant 0 : index
    %4 = vector.load %arg2[%c0_2, %c0_3] : memref<128x128xf32, #tpu.memory_space<vmem>>, vector<128x128xf32>
    %cst = arith.constant dense<0.000000e+00> : vector<128x128xf32>
    %5 = tpu.matmul %3, %4, %cst {dimension_numbers = #tpu.dot_dimension_numbers<[1], [0], [0], [1], [0, 0, 1, 1], [], []>} : vector<128x128xf32>, vector<128x128xf32>, vector<128x128xf32> -> vector<128x128xf32>
    %c0_4 = arith.constant 0 : index
    %c0_5 = arith.constant 0 : index
    %6 = vector.load %arg3[%c0_4, %c0_5] : memref<128x128xf32, #tpu.memory_space<vmem>>, vector<128x128xf32>
    tpu.vector_store %arg3[%c0_4, %c0_5], %5 {strides = array<i32>} : memref<128x128xf32, #tpu.memory_space<vmem>>, vector<128x128xf32>,
    %c0_6 = arith.constant 0 : index
    %c0_7 = arith.constant 0 : index
    %7 = vector.load %arg4[%c0_6, %c0_7] : memref<1x128xf32, #tpu.memory_space<vmem>>, vector<1x128xf32>
    %cst_8 = arith.constant dense<0.000000e+00> : vector<128xf32>
    %8 = vector.multi_reduction <add>, %5, %cst_8 [0] : vector<128x128xf32> to vector<128xf32>
    %9 = vector.shape_cast %8 : vector<128xf32> to vector<1x128xf32>
    %10 = arith.addf %7, %9 : vector<1x128xf32>
    %c0_9 = arith.constant 0 : index
    %c0_10 = arith.constant 0 : index
    %11 = vector.load %arg4[%c0_9, %c0_10] : memref<1x128xf32, #tpu.memory_space<vmem>>, vector<1x128xf32>
    tpu.vector_store %arg4[%c0_9, %c0_10], %10 {strides = array<i32>} : memref<1x128xf32, #tpu.memory_space<vmem>>, vector<1x128xf32>,
    %c0_11 = arith.constant 0 : index
    %c0_12 = arith.constant 0 : index
    %12 = vector.load %arg5[%c0_11, %c0_12] : memref<1x128xf32, #tpu.memory_space<vmem>>, vector<1x128xf32>
    %13 = arith.mulf %5, %5 : vector<128x128xf32>
    %cst_13 = arith.constant dense<0.000000e+00> : vector<128xf32>
    %14 = vector.multi_reduction <add>, %13, %cst_13 [0] : vector<128x128xf32> to vector<128xf32>
    %15 = vector.shape_cast %14 : vector<128xf32> to vector<1x128xf32>
    %16 = arith.addf %12, %15 : vector<1x128xf32>
    %c0_14 = arith.constant 0 : index
    %c0_15 = arith.constant 0 : index
    %17 = vector.load %arg5[%c0_14, %c0_15] : memref<1x128xf32, #tpu.memory_space<vmem>>, vector<1x128xf32>
    tpu.vector_store %arg5[%c0_14, %c0_15], %16 {strides = array<i32>} : memref<1x128xf32, #tpu.memory_space<vmem>>, vector<1x128xf32>,
    return
  }
  func.func @transform_0(%arg0: i32) -> (i32, i32) {
    %c0_i32 = arith.constant 0 : i32
    %c0_i32_0 = arith.constant 0 : i32
    return %arg0, %c0_i32 : i32, i32
  }
  func.func @transform_1(%arg0: i32) -> (i32, i32) {
    %c0_i32 = arith.constant 0 : i32
    %c0_i32_0 = arith.constant 0 : i32
    %c0_i32_1 = arith.constant 0 : i32
    return %c0_i32, %c0_i32_0 : i32, i32
  }
  func.func @transform_2(%arg0: i32) -> (i32, i32) {
    %c0_i32 = arith.constant 0 : i32
    %c0_i32_0 = arith.constant 0 : i32
    return %arg0, %c0_i32 : i32, i32
  }
  func.func @transform_3(%arg0: i32) -> (i32, i32) {
    %c0_i32 = arith.constant 0 : i32
    %c0_i32_0 = arith.constant 0 : i32
    %c0_i32_1 = arith.constant 0 : i32
    return %c0_i32, %c0_i32_0 : i32, i32
  }
  func.func @transform_4(%arg0: i32) -> (i32, i32) {
    %c0_i32 = arith.constant 0 : i32
    %c0_i32_0 = arith.constant 0 : i32
    %c0_i32_1 = arith.constant 0 : i32
    return %c0_i32, %c0_i32_0 : i32, i32
  }
}

</mosaic_0001>

<bundles_post_ra>
// kernel: tpu_custom_call.1
= control target key start
LH: loop header
LB: loop body
LE: loop exit
PB: predicated region body
PF: predicated region fallthrough
CT: control target
= control target key end

     0   :  { %10 = vsyncpa [#allocation3], 0  ;;  %s1416_s0 = inlined_call_operand.hbm [shape: f32[512,128], index: 0, kind: input, shape index: {}]   ;;  %s1417_s1 = inlined_call_operand.hbm [shape: f32[128,128], index: 1, kind: input, shape index: {}]   ;;  %s1418_s2 = inlined_call_operand.hbm [shape: f32[512,128], index: 2, kind: output, shape index: {0}]   ;;  %s1419_s3 = inlined_call_operand.hbm [shape: f32[1,128], index: 3, kind: output, shape index: {1}]   ;;  %s1420_s4 = inlined_call_operand.hbm [shape: f32[1,128], index: 4, kind: output, shape index: {2}]  }
   0x1   :  { %12 = vsyncpa [#allocation3 + $0x1], 0 }
   0x2   :  { %13 = vsyncpa [#allocation6], 0 }
   0x3   :  { %14 = vsyncpa [#allocation4], 0 }
   0x4   :  { %16 = vsyncpa [#allocation4 + $0x1], 0 }
   0x5   :  { %17 = vsyncpa [#allocation9], 0  ;;  %s1088_s15 = smov 0   ;;  %s1090_s16 = smov 0  }
   0x6   :  { %s1092_s17 = smov 0   ;;  %s1094_s18 = smov 0  }
   0x7 LB: > { %s1109_s19 = sadd.s32 4294967295, %s1051_s18   ;;  %s632_s20 = sadd.s32 4294967294, %s1051_s18   ;;  %s1051_s18 = sphi %s1094_s18, %s1447_s18   ;;  %s1047_s17 = sphi %s1092_s17, %s1446_s17   ;;  %s1043_s16 = sphi %s1090_s16, %s1445_s16   ;;  %s1039_s15 = sphi %s1088_s15, %s1444_s15  }
   0x8   : > { %p43_p0 = scmp.ne.s32.totalorder %s1043_s16, %s1039_s15  ;;  %p1421_p1 = scmp.eq.s32.totalorder %s1109_s19, 0 }
   0x9   : > { %p94_p3 = scmp.eq.s32.totalorder %s632_s20, 3  ;;  %p633_p5 = scmp.ge.s32.totalorder %s1051_s18, 1 }
   0xa   : > { %p1118_p4 = por %p1421_p1, %p43_p0  ;;  %p143_p7 = scmp.lt.s32.totalorder %s1051_s18, 5 }
   0xb   : > { %p1123_p6 = por %p94_p3, %p43_p0  ;;  %s1053_s24 = smov [#allocation5]  }
   0xc   : > { %s1424_s21 = scalar_select %p1118_p4, 1, 0 }
   0xd   : > { %s1425_s22 = scalar_select %p1123_p6, 1, 0 }
   0xe   : > { %p1129_p9 = pnand %p633_p5, %p143_p7  ;;  %s155_s25 = sshll.u32 %s1053_s24, 4  ;;  %s156_s25 = int_to_ptr.vmem [resolvable:$true] %s155_s25 }
   0xf   : > { %s1142_s27 = sadd.s32 1, %s1051_s18   ;;  %s30_s28 = sadd.s32 1, %s1047_s17 }
  0x10   : > { %s1426_s23 = scalar_select %p1129_p9, 1, 0 }
  0x11   : > { %p807_p10 = pneg %p1129_p9  ;;  %s27_s29 = ssub.s32 %s1051_s18, %s1142_s27 }
  0x12   : > { %s867_s6 = scalar_lea.hbm %s1417_s1, 2048 }
  0x13   : > { %p1137_p11 = pnand %p807_p10, %p1421_p1  ;;  %p868_p12 = scmp.ne.s32.totalorder %s1417_s1, %s867_s6 }
  0x14   : > { %p874_p5 = scmp.lt.u32.totalorder %s867_s6, %s1417_s1 }
  0x15   : > { %p869_p13 = pneg %p1137_p11 }
  0x17   : > { %p870_p0 = pnand %p869_p13, %p868_p12 }
  0x19   : > { %p871_p3 = pneg %p870_p0 }
  0x1b   : > { %p876_p7 = pnand %p874_p5, %p871_p3 }
  0x1d   : > { %879 = shalt.err (!%p876_p7)
}
  0x1e   : > { %s880_s11 = scalar_lea.vmem %s156_s25, 2048  ;;  %p888_p2 = scmp.lt.s32.totalorder %s156_s25, %s156_s25 }
  0x1f   : > { %p881_p10 = scmp.ne.s32.totalorder %s156_s25, %s880_s11  ;;  %p889_p6 = scmp.lt.s32.totalorder %s880_s11, %s880_s11 }
  0x21   : > { %p883_p8 = pnand %p881_p10, %p869_p13  ;;  %p890_p4 = por %p889_p6, %p888_p2 }
  0x23   : > { %p884_p1 = pneg %p883_p8 }
  0x25   : > { %p891_p9 = pnand %p890_p4, %p884_p1 }
  0x27   : > { %894 = shalt.err (!%p891_p9)
}
  0x28   : > { %s1054_s12 = smov 128   ;;  %s1055_s13 = smov 8  }
  0x29   : > { %810 = dma.hbm_to_vmem [thread:$0]  (!%p1137_p11), %s1417_s1, 2048, %s156_s25, [#allocation6], %s1054_s12, %s1054_s12, %s1055_s13  }
  0x2a   : > { %p28_p1 = scmp.eq.s32.totalorder %s27_s29, 0  ;;  %p37_p2 = scmp.ne.s32.totalorder %s1047_s17, %s1043_s16 }
  0x2b   : > { %p38_p4 = scmp.eq.s32.totalorder %s1051_s18, 0  ;;  %p820_p6 = scmp.lt.s32.totalorder %s1051_s18, 4 }
  0x2c   : > { %s1171_s24 = scalar_select %p28_p1, %s1047_s17, %s30_s28  }
  0x2d   : > { %p39_p8 = por %p38_p4, %p37_p2  ;;  %p1428_p9 = scmp.eq.s32.totalorder %s1109_s19, 3 }
  0x2e   : > { %s169_s26 = sand.u32 1, %s1047_s17   ;;  %s653_s5 = sshll.u32 %s1051_s18, 11 }
  0x2f   : > { %p1175_p12 = por %p1428_p9, %p37_p2  ;;  %s636_s6 = sshll.u32 %s169_s26, 7 }
  0x30   : > { %s1184_s9 = scalar_lea.hbm %s1416_s0, %s653_s5  ;;  %s173_s25 = scalar_lea.vmem [#allocation2], %s636_s6 }
  0x31   : > { %s180_s28 = sshll.u32 %s173_s25, 4  ;;  %p1186_p11 = pnand %p820_p6, %p39_p8  ;;  %s1190_s28 = int_to_ptr.vmem [resolvable:$true] %s180_s28 }
  0x32   : > { %s1192_s10 = scalar_lea.sflag [#allocation3], %s169_s26  ;;  %s895_s11 = scalar_lea.hbm %s1184_s9, 2048 }
  0x33   : > { %p896_p13 = scmp.ne.s32.totalorder %s1184_s9, %s895_s11  ;;  %p897_p0 = pneg %p1186_p11 }
  0x34   : > { %s900_s5 = scalar_lea.hbm %s1416_s0, 8192  ;;  %p901_p7 = scmp.lt.u32.totalorder %s1184_s9, %s1416_s0 }
  0x35   : > { %p898_p3 = pnand %p897_p0, %p896_p13  ;;  %p902_p10 = scmp.lt.u32.totalorder %s900_s5, %s895_s11 }
  0x36   : > { %p904_p2 = scmp.lt.u32.totalorder %s895_s11, %s1184_s9 }
  0x37   : > { %p899_p5 = pneg %p898_p3  ;;  %p903_p1 = por %p902_p10, %p901_p7 }
  0x39   : > { %p905_p4 = por %p904_p2, %p903_p1 }
  0x3b   : > { %p906_p6 = pnand %p905_p4, %p899_p5 }
  0x3d   : > { %909 = shalt.err (!%p906_p6)
}
  0x3e   : > { %s910_s26 = scalar_lea.vmem %s1190_s28, 2048  ;;  %s1056_s8 = smov [#allocation2]  }
  0x3f   : > { %p911_p8 = scmp.ne.s32.totalorder %s1190_s28, %s910_s26  ;;  %s915_s25 = sshll.u32 %s1056_s8, 4  ;;  %s916_s25 = int_to_ptr.vmem [resolvable:$false] %s915_s25 }
  0x40   : > { %s917_s14 = scalar_lea.vmem %s916_s25, 4096  ;;  %p918_p3 = scmp.lt.s32.totalorder %s1190_s28, %s916_s25 }
  0x41   : > { %p913_p9 = pnand %p911_p8, %p897_p0  ;;  %p919_p7 = scmp.lt.s32.totalorder %s917_s14, %s910_s26 }
  0x43   : > { %p914_p13 = pneg %p913_p9  ;;  %p920_p10 = por %p919_p7, %p918_p3 }
  0x45   : > { %p921_p1 = pnand %p920_p10, %p914_p13 }
  0x47   : > { %924 = shalt.err (!%p921_p1)
}
  0x48   : > { %814 = dma.hbm_to_vmem [thread:$0]  (!%p1186_p11), %s1184_s9, 2048, %s1190_s28, %s1192_s10, %s1054_s12, %s1054_s12, %s1055_s13  }
  0x49   : > { %p1431_p0 = scmp.ne.s32.totalorder %s1426_s23, 0 }
  0x4a   : > { %s1226_s11 = sand.u32 (!%p1431_p0), 1, %s1043_s16   ;;  %p1432_p5 = scmp.ne.s32.totalorder (!%p1431_p0), %s1424_s21, 0 }
  0x4b   : > { %192 = sbr.rel (%p1431_p0) target bundleno = 439 (0x1b7), region = 28  ;;  %s640_s20 = sshll.u32 (!%p1431_p0), %s1226_s11, 7 }
  0x4c   : > { %s195_s5 = scalar_lea.sflag (!%p1431_p0), [#allocation3], %s1226_s11  ;;  %s1230_s6 = scalar_lea.vmem (!%p1431_p0), [#allocation2], %s640_s20 }
  0x52   : > { %1022 = dma.done.wait (%p1432_p5), %s195_s5, 2048  }
  0x53   : > { %1024 = vsyncadd (%p1432_p5), %s195_s5, 4294965248  ;;  %p1433_p11 = scmp.eq.s32.totalorder %s1109_s19, 0 }
  0x55   : > { %1026 = dma.done.wait (%p1433_p11), [#allocation6], 2048   ;;  %p1434_p2 = pmov %p1433_p11 }
  0x56   : > { %s1240_s23 = scalar_lea.vmem [#allocation7], %s640_s20  ;;  %p1435_p4 = scmp.ne.s32.totalorder %s1109_s19, 0 }
  0x57   : > { %1028 = vsyncadd (%p1434_p2), [#allocation6], 4294965248  ;;  %v1057_v0 = vmov (!%p1435_p4), 0.0  }
  0x58   : > { %232 = sbr.rel (%p1435_p4) target bundleno = 95 (0x5f), region = 40  ;;  %233 = vst [vmem:[#allocation8] sm:$0x1] (!%p1435_p4), %v1057_v0  ;;  %234 = vst [vmem:[#allocation10] sm:$0x1] (!%p1435_p4), %v1057_v0 }
  0x5f PF: > { %v251_v1 = vld [vmem:[#allocation5] sm:$0xff]  ;;  %v252_v2 = vld [vmem:[#allocation5 + $0x8] sm:$0xff]  ;;  %v253_v3 = vld [vmem:[#allocation5 + $0x10] sm:$0xff]  ;;  %s654_s21 = sshll.u32 %s1109_s19, 11  ;;  %s506_s12 = sshll.u32 %s1240_s23, 4  ;;  %s1297_s12 = int_to_ptr.vmem [resolvable:$true] %s506_s12 }
  0x60   : > { %v743_v4 = vpack.c.bf16 %v252_v2, %v251_v1  ;;  %v254_v5 = vld [vmem:[#allocation5 + $0x18] sm:$0xff]  ;;  %v255_v7 = vld [vmem:[#allocation5 + $0x20] sm:$0xff]  ;;  %v256_v8 = vld [vmem:[#allocation5 + $0x28] sm:$0xff]  ;;  %s1295_s28 = scalar_lea.hbm %s1418_s2, %s654_s21  ;;  %s493_s29 = scalar_lea.sflag [#allocation4], %s1226_s11 }
  0x61   : > { %v747_v6 = vpack.c.bf16 %v254_v5, %v253_v3  ;;  %v751_v9 = vpack.c.bf16 %v256_v8, %v255_v7  ;;  %v235_v10 = vld [vmem:[%s1230_s6] sm:$0xff]  ;;  %v257_v11 = vld [vmem:[#allocation5 + $0x30] sm:$0xff]  ;;  %v258_v12 = vld [vmem:[#allocation5 + $0x38] sm:$0xff]  ;;  %s925_s10 = scalar_lea.vmem %s1297_s12, 2048  ;;  %s1058_s7 = smov [#allocation7]  }
  0x62   : > { %744 = vmatprep.subr.bf16.mxu0 %v743_v4  ;;  %775 = vmatprep.subr.bf16.mxu1 %v743_v4  ;;  %v243_v13 = vld [vmem:[%s1230_s6 + $0x40] sm:$0xff]  ;;  %v755_v14 = vpack.c.bf16 %v258_v12, %v257_v11  ;;  %v260_v16 = vld [vmem:[#allocation5 + $0x48] sm:$0xff]  ;;  %v261_v18 = vld [vmem:[#allocation5 + $0x50] sm:$0xff]  ;;  %p926_p6 = scmp.ne.s32.totalorder %s1297_s12, %s925_s10  ;;  %s929_s26 = sshll.u32 %s1058_s7, 4  ;;  %s930_s26 = int_to_ptr.vmem [resolvable:$false] %s929_s26 }
  0x63   : > { %746 = vmatpush3.bf16.msra.mxu0 %v743_v4  ;;  %783 = vmatpush3.bf16.msra.mxu1 %v743_v4  ;;  %v259_v15 = vld [vmem:[#allocation5 + $0x40] sm:$0xff]  ;;  %v262_v19 = vld [vmem:[#allocation5 + $0x58] sm:$0xff]  ;;  %v264_v22 = vld [vmem:[#allocation5 + $0x68] sm:$0xff]  ;;  %s931_s8 = scalar_lea.vmem %s930_s26, 4096  ;;  %p932_p13 = scmp.lt.s32.totalorder %s1297_s12, %s930_s26 }
  0x64   : > { %748 = vmatprep.subr.bf16.mxu0 %v747_v6  ;;  %776 = vmatprep.subr.bf16.mxu1 %v747_v6  ;;  %v759_v17 = vpack.c.bf16 %v260_v16, %v259_v15  ;;  %v763_v20 = vpack.c.bf16 %v262_v19, %v261_v18  ;;  %v263_v21 = vld [vmem:[#allocation5 + $0x60] sm:$0xff]  ;;  %v265_v24 = vld [vmem:[#allocation5 + $0x70] sm:$0xff]  ;;  %v266_v25 = vld [vmem:[#allocation5 + $0x78] sm:$0xff]  ;;  %p927_p8 = pnand %p926_p6, %p1175_p12  ;;  %p933_p3 = scmp.lt.s32.totalorder %s931_s8, %s925_s10 }
  0x65   : > { %719 = vmatprep.mubr.f32.mxu0 %v235_v10  ;;  %731 = vmatprep.mubr.f32.mxu1 %v243_v13  ;;  %v767_v23 = vpack.c.bf16 %v264_v22, %v263_v21  ;;  %v771_v26 = vpack.c.bf16 %v266_v25, %v265_v24  ;;  %v236_v27 = vld [vmem:[%s1230_s6 + $0x8] sm:$0xff]  ;;  %v237_v29 = vld [vmem:[%s1230_s6 + $0x10] sm:$0xff]  ;;  %v238_v31 = vld [vmem:[%s1230_s6 + $0x18] sm:$0xff] }
  0x66   : > { %v244_v28 = vld [vmem:[%s1230_s6 + $0x48] sm:$0xff]  ;;  %v245_v30 = vld [vmem:[%s1230_s6 + $0x50] sm:$0xff]  ;;  %v246_v32 = vld [vmem:[%s1230_s6 + $0x58] sm:$0xff]  ;;  %p928_p9 = pneg %p927_p8  ;;  %p934_p7 = por %p933_p3, %p932_p13 }
  0x67   : > { %750 = vmatpush3.bf16.msra.mxu0 %v747_v6  ;;  %784 = vmatpush3.bf16.msra.mxu1 %v747_v6  ;;  %v239_v33 = vld [vmem:[%s1230_s6 + $0x20] sm:$0xff]  ;;  %v240_v35 = vld [vmem:[%s1230_s6 + $0x28] sm:$0xff]  ;;  %v241_v37 = vld [vmem:[%s1230_s6 + $0x30] sm:$0xff] }
  0x68   : > { %752 = vmatprep.subr.bf16.mxu0 %v751_v9  ;;  %777 = vmatprep.subr.bf16.mxu1 %v751_v9  ;;  %v247_v34 = vld [vmem:[%s1230_s6 + $0x60] sm:$0xff]  ;;  %v248_v36 = vld [vmem:[%s1230_s6 + $0x68] sm:$0xff]  ;;  %v249_v38 = vld [vmem:[%s1230_s6 + $0x70] sm:$0xff]  ;;  %p935_p10 = pnand %p934_p7, %p928_p9 }
  0x69   : > { %v242_v39 = vld [vmem:[%s1230_s6 + $0x38] sm:$0xff] }
  0x6a   : > { %v250_v40 = vld [vmem:[%s1230_s6 + $0x78] sm:$0xff] }
  0x6b   : > { %754 = vmatpush3.bf16.msra.mxu0 %v751_v9  ;;  %785 = vmatpush3.bf16.msra.mxu1 %v751_v9 }
  0x6c   : > { %756 = vmatprep.subr.bf16.mxu0 %v755_v14  ;;  %778 = vmatprep.subr.bf16.mxu1 %v755_v14 }
  0x6f   : > { %758 = vmatpush3.bf16.msra.mxu0 %v755_v14  ;;  %786 = vmatpush3.bf16.msra.mxu1 %v755_v14 }
  0x70   : > { %760 = vmatprep.subr.bf16.mxu0 %v759_v17  ;;  %779 = vmatprep.subr.bf16.mxu1 %v759_v17 }
  0x73   : > { %762 = vmatpush3.bf16.msra.mxu0 %v759_v17  ;;  %787 = vmatpush3.bf16.msra.mxu1 %v759_v17 }
  0x74   : > { %764 = vmatprep.subr.bf16.mxu0 %v763_v20  ;;  %780 = vmatprep.subr.bf16.mxu1 %v763_v20 }
  0x77   : > { %766 = vmatpush3.bf16.msra.mxu0 %v763_v20  ;;  %788 = vmatpush3.bf16.msra.mxu1 %v763_v20 }
  0x78   : > { %768 = vmatprep.subr.bf16.mxu0 %v767_v23  ;;  %781 = vmatprep.subr.bf16.mxu1 %v767_v23 }
  0x7b   : > { %770 = vmatpush3.bf16.msra.mxu0 %v767_v23  ;;  %789 = vmatpush3.bf16.msra.mxu1 %v767_v23 }
  0x7c   : > { %772 = vmatprep.subr.bf16.mxu0 %v771_v26  ;;  %782 = vmatprep.subr.bf16.mxu1 %v771_v26 }
  0x7f   : > { %774 = vmatpush3.bf16.msra.mxu0 %v771_v26  ;;  %790 = vmatpush3.bf16.msra.mxu1 %v771_v26 }
  0x82   : > { %720 = vmatmul.mubr.f32.vlgmr.msra.gmra.mrb[0].mxu0 %v236_v27  ;;  %732 = vmatmul.mubr.f32.vlgmr.msra.gmra.mrb[0].mxu1 %v244_v28 }
  0x83   : > { %722 = vmatprep.mubr.f32.mxu0 %v237_v29  ;;  %734 = vmatprep.mubr.f32.mxu1 %v245_v30 }
  0x86   : > { %723 = vmatmul.mubr.f32.gmra.mrb[2].mxu0 %v238_v31  ;;  %735 = vmatmul.mubr.f32.gmra.mrb[2].mxu1 %v246_v32 }
  0x87   : > { %725 = vmatprep.mubr.f32.mxu0 %v239_v33  ;;  %737 = vmatprep.mubr.f32.mxu1 %v247_v34 }
  0x8a   : > { %726 = vmatmul.mubr.f32.gmra.mrb[4].mxu0 %v240_v35  ;;  %738 = vmatmul.mubr.f32.gmra.mrb[4].mxu1 %v248_v36 }
  0x8b   : > { %728 = vmatprep.mubr.f32.mxu0 %v241_v37  ;;  %740 = vmatprep.mubr.f32.mxu1 %v249_v38 }
  0x8e   : > { %729 = vmatmul.mubr.f32.gmra.mrb[6].mxu0 %v242_v39  ;;  %741 = vmatmul.mubr.f32.gmra.mrb[6].mxu1 %v250_v40 }
 0x155   : > { %v721_v41 = vpop.f32.mrb[0].mxu0  ;;  %v1260_v42 = vpop.f32.mrb[0].mxu1 }
 0x156   : > { %413 = vst [vmem:[%s1240_s23 + $0x8] sm:$0xff] %v721_v41  ;;  %v454_v43 = vmul.f32 %v721_v41, %v721_v41  ;;  %v333_v44 = vpop.f32.mrb[1].mxu0  ;;  %421 = vst [vmem:[%s1240_s23 + $0x48] sm:$0xff] %v1260_v42  ;;  %v1265_v45 = vpop.f32.mrb[1].mxu1 }
 0x157   : > { %412 = vst [vmem:[%s1240_s23] sm:$0xff] %v333_v44  ;;  %v429_v46 = vadd.f32 %v721_v41, %v333_v44  ;;  %v453_v47 = vmul.f32 %v333_v44, %v333_v44  ;;  %420 = vst [vmem:[%s1240_s23 + $0x40] sm:$0xff] %v1265_v45 }
 0x159   : > { %v469_v48 = vadd.f32 %v454_v43, %v453_v47  ;;  %v724_v49 = vpop.f32.mrb[2].mxu0  ;;  %v1270_v50 = vpop.f32.mrb[2].mxu1 }
 0x15a   : > { %415 = vst [vmem:[%s1240_s23 + $0x18] sm:$0xff] %v724_v49  ;;  %v343_v51 = vpop.f32.mrb[3].mxu0  ;;  %423 = vst [vmem:[%s1240_s23 + $0x58] sm:$0xff] %v1270_v50  ;;  %v1275_v52 = vpop.f32.mrb[3].mxu1  ;;  %v456_v55 = vmul.f32 %v724_v49, %v724_v49 }
 0x15b   : > { %414 = vst [vmem:[%s1240_s23 + $0x10] sm:$0xff] %v343_v51  ;;  %v430_v53 = vadd.f32 %v429_v46, %v343_v51  ;;  %v455_v54 = vmul.f32 %v343_v51, %v343_v51  ;;  %422 = vst [vmem:[%s1240_s23 + $0x50] sm:$0xff] %v1275_v52 }
 0x15d   : > { %v470_v56 = vadd.f32 %v469_v48, %v455_v54  ;;  %v727_v57 = vpop.f32.mrb[4].mxu0  ;;  %v431_v58 = vadd.f32 %v724_v49, %v430_v53  ;;  %v1280_v59 = vpop.f32.mrb[4].mxu1 }
 0x15e   : > { %417 = vst [vmem:[%s1240_s23 + $0x28] sm:$0xff] %v727_v57  ;;  %v353_v60 = vpop.f32.mrb[5].mxu0  ;;  %425 = vst [vmem:[%s1240_s23 + $0x68] sm:$0xff] %v1280_v59  ;;  %v1287_v61 = vpop.f32.mrb[5].mxu1  ;;  %v458_v1 = vmul.f32 %v727_v57, %v727_v57 }
 0x15f   : > { %416 = vst [vmem:[%s1240_s23 + $0x20] sm:$0xff] %v353_v60  ;;  %v432_v62 = vadd.f32 %v431_v58, %v353_v60  ;;  %v457_v63 = vmul.f32 %v353_v60, %v353_v60  ;;  %v471_v0 = vadd.f32 %v470_v56, %v456_v55  ;;  %424 = vst [vmem:[%s1240_s23 + $0x60] sm:$0xff] %v1287_v61 }
 0x161   : > { %v472_v2 = vadd.f32 %v471_v0, %v457_v63  ;;  %v730_v3 = vpop.f32.mrb[6].mxu0  ;;  %v433_v4 = vadd.f32 %v727_v57, %v432_v62  ;;  %v1299_v5 = vpop.f32.mrb[6].mxu1 }
 0x162   : > { %419 = vst [vmem:[%s1240_s23 + $0x38] sm:$0xff] %v730_v3  ;;  %v363_v6 = vpop.f32.mrb[7].mxu0  ;;  %427 = vst [vmem:[%s1240_s23 + $0x78] sm:$0xff] %v1299_v5  ;;  %v403_v7 = vpop.f32.mrb[7].mxu1 }
 0x163   : > { %418 = vst [vmem:[%s1240_s23 + $0x30] sm:$0xff] %v363_v6  ;;  %v434_v8 = vadd.f32 %v433_v4, %v363_v6  ;;  %v459_v9 = vmul.f32 %v363_v6, %v363_v6  ;;  %v473_v10 = vadd.f32 %v472_v2, %v458_v1  ;;  %426 = vst [vmem:[%s1240_s23 + $0x70] sm:$0xff] %v403_v7 }
 0x164   : > { %938 = shalt.err (!%p935_p10)
}
 0x165   : > { %s939_s25 = scalar_lea.hbm %s1295_s28, 2048  ;;  %s943_s5 = scalar_lea.hbm %s1418_s2, 8192 }
 0x166   : > { %p940_p1 = scmp.ne.s32.totalorder %s1295_s28, %s939_s25  ;;  %p944_p11 = scmp.lt.u32.totalorder %s1295_s28, %s1418_s2 }
 0x167   : > { %p945_p2 = scmp.lt.u32.totalorder %s943_s5, %s939_s25  ;;  %p947_p6 = scmp.lt.u32.totalorder %s939_s25, %s1295_s28 }
 0x168   : > { %p941_p0 = pnand %p940_p1, %p1175_p12 }
 0x169   : > { %p946_p4 = por %p945_p2, %p944_p11 }
 0x16a   : > { %p942_p5 = pneg %p941_p0 }
 0x16b   : > { %p948_p8 = por %p947_p6, %p946_p4 }
 0x16d   : > { %p949_p9 = pnand %p948_p8, %p942_p5 }
 0x16f   : > { %952 = shalt.err (!%p949_p9)
}
 0x170   : > { %s1059_s21 = smov 128   ;;  %s1060_s13 = smov 8   ;;  %v460_v11 = vmul.f32 %v730_v3, %v730_v3  ;;  %v435_v12 = vadd.f32 %v730_v3, %v434_v8  ;;  %v474_v13 = vadd.f32 %v473_v10, %v459_v9  ;;  %v461_v14 = vmul.f32 %v1265_v45, %v1265_v45  ;;  %v428_v48 = vld [vmem:[#allocation8] sm:$0x1]  ;;  %v452_v51 = vld [vmem:[#allocation10] sm:$0x1] }
 0x171   : > { %797 = dma.vmem_to_hbm [thread:$0]  (%p1175_p12), %s1297_s12, 2048, %s1295_s28, %s493_s29, %s1059_s21, %s1059_s21, %s1060_s13   ;;  %v462_v17 = vmul.f32 %v1260_v42, %v1260_v42  ;;  %v463_v20 = vmul.f32 %v1275_v52, %v1275_v52  ;;  %v464_v23 = vmul.f32 %v1270_v50, %v1270_v50  ;;  %v465_v26 = vmul.f32 %v1287_v61, %v1287_v61 }
 0x172   : > { %v475_v15 = vadd.f32 %v474_v13, %v460_v11  ;;  %v436_v16 = vadd.f32 %v435_v12, %v1265_v45  ;;  %v466_v29 = vmul.f32 %v1280_v59, %v1280_v59  ;;  %v467_v32 = vmul.f32 %v403_v7, %v403_v7  ;;  %s1061_s30 = smov [#allocation8]   ;;  %s1062_s12 = smov [#allocation10]  }
 0x173   : > { %v468_v35 = vmul.f32 %v1299_v5, %v1299_v5  ;;  %s520_s11 = sshll.u32 %s1061_s30, 4  ;;  %s531_s9 = sshll.u32 %s1062_s12, 4  ;;  %s521_s11 = int_to_ptr.vmem [resolvable:$true] %s520_s11  ;;  %s1351_s9 = int_to_ptr.vmem [resolvable:$true] %s531_s9 }
 0x174   : > { %v476_v18 = vadd.f32 %v475_v15, %v461_v14  ;;  %v437_v19 = vadd.f32 %v1260_v42, %v436_v16  ;;  %s953_s28 = scalar_lea.vmem %s521_s11, 16  ;;  %p1436_p13 = scmp.eq.s32.totalorder %s1109_s19, 3 }
 0x175   : > { %p954_p12 = scmp.ne.s32.totalorder %s521_s11, %s953_s28  ;;  %s959_s29 = scalar_lea.vmem %s521_s11, 32 }
 0x176   : > { %v438_v21 = vadd.f32 %v437_v19, %v1275_v52  ;;  %v477_v22 = vadd.f32 %v476_v18, %v462_v17  ;;  %p960_p10 = scmp.lt.s32.totalorder %s521_s11, %s521_s11  ;;  %p961_p1 = scmp.lt.s32.totalorder %s959_s29, %s953_s28 }
 0x177   : > { %p955_p3 = pnand %p954_p12, %p1436_p13 }
 0x178   : > { %v478_v24 = vadd.f32 %v477_v22, %v463_v20  ;;  %v439_v25 = vadd.f32 %v1270_v50, %v438_v21  ;;  %p962_p0 = por %p961_p1, %p960_p10 }
 0x179   : > { %p956_p7 = pneg %p955_p3 }
 0x17a   : > { %v440_v27 = vadd.f32 %v439_v25, %v1287_v61  ;;  %v479_v28 = vadd.f32 %v478_v24, %v464_v23 }
 0x17b   : > { %p963_p5 = pnand %p962_p0, %p956_p7 }
 0x17c   : > { %v480_v30 = vadd.f32 %v479_v28, %v465_v26  ;;  %v441_v31 = vadd.f32 %v1280_v59, %v440_v27 }
 0x17e   : > { %v442_v33 = vadd.f32 %v441_v31, %v403_v7  ;;  %v481_v34 = vadd.f32 %v480_v30, %v466_v29 }
 0x180   : > { %v443_v36 = vadd.f32 %v1299_v5, %v442_v33  ;;  %v482_v37 = vadd.f32 %v481_v34, %v467_v32 }
 0x182   : > { %v444_v38 = vrot.slane %v443_v36, 4  ;;  %v483_v39 = vadd.f32 %v482_v37, %v468_v35 }
 0x184   : > { %v445_v40 = vadd.f32 %v444_v38, %v443_v36  ;;  %v484_v41 = vrot.slane %v483_v39, 4 }
 0x186   : > { %v446_v42 = vrot.slane %v445_v40, 2  ;;  %v485_v43 = vadd.f32 %v484_v41, %v483_v39 }
 0x188   : > { %v447_v44 = vadd.f32 %v446_v42, %v445_v40  ;;  %v486_v45 = vrot.slane %v485_v43, 2 }
 0x18a   : > { %v448_v46 = vrot.slane %v447_v44, 1  ;;  %v487_v47 = vadd.f32 %v486_v45, %v485_v43 }
 0x18c   : > { %v449_v49 = vadd.f32 %v448_v46, %v447_v44  ;;  %v488_v50 = vrot.slane %v487_v47, 1 }
 0x18e   : > { %v450_v52 = vadd.f32 %v449_v49, %v428_v48  ;;  %v489_v53 = vadd.f32 %v488_v50, %v487_v47 }
 0x190   : > { %451 = vst [vmem:[#allocation8] sm:$0x1] %v450_v52  ;;  %v490_v54 = vadd.f32 %v489_v53, %v452_v51 }
 0x191   : > { %966 = shalt.err (!%p963_p5)
}
 0x192   : > { %s967_s26 = scalar_lea.hbm %s1419_s3, 16  ;;  %p1437_p2 = pmov %p1436_p13 }
 0x193   : > { %p968_p11 = scmp.ne.s32.totalorder %s1419_s3, %s967_s26  ;;  %p973_p8 = scmp.lt.u32.totalorder %s967_s26, %s1419_s3 }
 0x195   : > { %p969_p4 = pnand %p968_p11, %p1437_p2 }
 0x197   : > { %p970_p6 = pneg %p969_p4 }
 0x199   : > { %p975_p9 = pnand %p973_p8, %p970_p6 }
 0x19b   : > { %978 = shalt.err (!%p975_p9)
}
 0x19c   : > { %p1438_p12 = pmov %p1437_p2  ;;  %491 = vst [vmem:[#allocation10] sm:$0x1] %v490_v54  ;;  %s979_s23 = scalar_lea.vmem %s1351_s9, 16 }
 0x19d   : > { %p980_p13 = scmp.ne.s32.totalorder %s1351_s9, %s979_s23  ;;  %p1439_p3 = pmov %p1437_p2 }
 0x19e   : > { %799 = dma.vmem_to_hbm [thread:$0]  (%p1438_p12), %s521_s11, 16, %s1419_s3, [#allocation9]  }
 0x19f   : > { %p981_p7 = pnand %p980_p13, %p1439_p3  ;;  %s985_s21 = scalar_lea.vmem %s1351_s9, 32 }
 0x1a0   : > { %p986_p1 = scmp.lt.s32.totalorder %s1351_s9, %s1351_s9  ;;  %p987_p0 = scmp.lt.s32.totalorder %s985_s21, %s979_s23 }
 0x1a1   : > { %p982_p10 = pneg %p981_p7 }
 0x1a2   : > { %p988_p5 = por %p987_p0, %p986_p1 }
 0x1a4   : > { %p989_p11 = pnand %p988_p5, %p982_p10 }
 0x1a6   : > { %992 = shalt.err (!%p989_p11)
}
 0x1a7   : > { %s993_s12 = scalar_lea.hbm %s1420_s4, 16  ;;  %p1440_p4 = pmov %p1439_p3 }
 0x1a8   : > { %p994_p2 = scmp.ne.s32.totalorder %s1420_s4, %s993_s12  ;;  %p999_p9 = scmp.lt.u32.totalorder %s993_s12, %s1420_s4 }
 0x1aa   : > { %p995_p6 = pnand %p994_p2, %p1440_p4 }
 0x1ac   : > { %p996_p8 = pneg %p995_p6 }
 0x1ae   : > { %p1001_p12 = pnand %p999_p9, %p996_p8 }
 0x1b0   : > { %1004 = shalt.err (!%p1001_p12)
}
 0x1b1   : > { %p1441_p13 = pmov %p1439_p3 }
 0x1b3   : > { %801 = dma.vmem_to_hbm [thread:$0]  (%p1441_p13), %s1351_s9, 16, %s1420_s4, [#allocation9]  }
 0x1b4   : > { %1030 = dma.done.wait (%p1439_p3), [#allocation9], 32   ;;  %p1442_p7 = pmov %p1439_p3 }
 0x1b6   : > { %1032 = vsyncadd (%p1442_p7), [#allocation9], 4294967264 }
 0x1b7 PF: > { %p826_p10 = scmp.ge.s32.totalorder %s1051_s18, 2  ;;  %s551_s8 = sand.u32 1, %s1039_s15  }
 0x1b8   : > { %p1443_p1 = scmp.ne.s32.totalorder %s1425_s22, 0  ;;  %s552_s25 = scalar_lea.sflag [#allocation4], %s551_s8 }
 0x1ba   : > { %p816_p0 = pnand %p826_p10, %p1443_p1 }
 0x1bc   : > { %1034 = dma.done.wait (!%p816_p0), %s552_s25, 2048  }
 0x1bd   : > { %1036 = vsyncadd (!%p816_p0), %s552_s25, 4294965248  ;;  %p20_p5 = scmp.ge.s32.totalorder %s1142_s27, 6   ;;  %s1444_s15 = smov %s1043_s16 }
 0x1be   : > { %s1445_s16 = smov %s1047_s17  ;;  %s1446_s17 = smov %s1171_s24 }
 0x1bf   : > { %s1447_s18 = smov %s1142_s27  ;;  %22 = sbr.rel (!%p20_p5) target bundleno = 7 (0x7), region = 97 }
 0x1c6   :  { %557 = vsyncpa [#allocation3], 1 }
 0x1c7   :  { %559 = vsyncpa [#allocation3 + $0x1], 1 }
 0x1c8   :  { %560 = vsyncpa [#allocation6], 1 }
 0x1c9   :  { %561 = vsyncpa [#allocation4], 1 }
 0x1ca   :  { %563 = vsyncpa [#allocation4 + $0x1], 1 }
 0x1cb   :  { %564 = vsyncpa [#allocation9], 1 }

</bundles_post_ra>
